<compile_context>
chip_gen: v5e
topology: v5e:2x2
jax: 0.10.0
libtpu: 0.0.40
codegen_flags: <defaults>
</compile_context>

<pallas_src>
from functools import partial

import jax
import jax.numpy as jnp
from jax.experimental import pallas as pl
from jax.experimental.pallas import tpu as pltpu


HIDDEN = 128      # fixed by the module definition
LANES = 128       # lane-dense output width
TB_CAP = 1024     # max batch-tile rows (see VMEM math in header comment)


def _round_up(x, m):
    return ((x + m - 1) // m) * m


def _cdiv(a, b):
    return -(-a // b)


def pack_params(w1, b1, w2, b2):
    """Pack (w1, b1, w2, b2) into one f32 slab with 8-row-aligned sections.

    Layout (columns = HIDDEN = 128):
      rows [0, in_pad)                  : w1 (rows beyond in_features are zero)
      rows [in_pad, in_pad+8)           : b1 in the first row, rest zero
      rows [in_pad+8, in_pad+8+HIDDEN)  : w2, zero-padded columns (n_actions->128)
      rows [in_pad+8+HIDDEN, ...+8)     : b2 in the first row (zero-padded cols)
    """
    in_features, hidden = w1.shape
    n_actions = w2.shape[1]
    assert hidden == HIDDEN, "module defines hidden width 128"
    assert n_actions <= LANES

    in_pad = _round_up(in_features, 8)
    rows = in_pad + 8 + hidden + 8

    packed = jnp.zeros((rows, hidden), jnp.float32)
    packed = packed.at[:in_features, :].set(w1.astype(jnp.float32))
    packed = packed.at[in_pad, :].set(b1.astype(jnp.float32))
    packed = packed.at[in_pad + 8:in_pad + 8 + hidden, :n_actions].set(
        w2.astype(jnp.float32))
    packed = packed.at[in_pad + 8 + hidden, :n_actions].set(
        b2.astype(jnp.float32))
    return packed


def _make_kernel(in_features, in_pad, hidden):
    b1_off = in_pad
    w2_off = in_pad + 8
    b2_off = in_pad + 8 + hidden

    def rel_kernel(x_ref, p_ref, o_ref):
        # Static views into the packed parameter slab (resident in VMEM).
        x = x_ref[...]                                   # (TB, in_features)
        w1 = p_ref[0:in_features, :]                     # (in_features, 128)
        b1 = p_ref[b1_off:b1_off + 1, :]                 # (1, 128)
        w2 = p_ref[w2_off:w2_off + hidden, :]            # (128, 128) col-padded
        b2 = p_ref[b2_off:b2_off + 1, :]                 # (1, 128)   col-padded

        h = jnp.dot(x, w1, preferred_element_type=jnp.float32) + b1
        h = jnp.maximum(h, 0.0)                          # ReLU
        o = jnp.dot(h, w2, preferred_element_type=jnp.float32) + b2
        o_ref[...] = o.astype(o_ref.dtype)               # lane-dense (TB, 128)

    return rel_kernel


@partial(jax.jit, static_argnames=("in_features", "n_actions"))
def rel_forward(x, packed, *, in_features, n_actions):
    """x: (B, in_features), packed: packed param slab -> (B, n_actions) f32."""
    B = x.shape[0]
    assert x.shape[1] == in_features
    rows, hidden = packed.shape
    in_pad = rows - hidden - 16
    assert in_pad == _round_up(in_features, 8)

    # ---- batch tiling -----------------------------------------------------
    # >= 2 grid steps whenever B8 >= 16 so both v7x TensorCores get work;
    # TB capped at 1024 (amortizes per-step overhead on v5e/v6e);
    # TB derived from ceil(B8/num_tiles) so padding waste is <= 8*num_tiles rows.
    B8 = _round_up(B, 8)
    num_tiles = 1 if B8 <= 8 else max(2, _cdiv(B8, TB_CAP))
    TB = _round_up(_cdiv(B8, num_tiles), 8)
    B_pad = num_tiles * TB

    x32 = x.astype(jnp.float32)
    x_in = x32 if B_pad == B else jnp.pad(x32, ((0, B_pad - B), (0, 0)))

    kernel = _make_kernel(in_features, in_pad, hidden)

    out_pad = pl.pallas_call(
        kernel,
        out_shape=jax.ShapeDtypeStruct((B_pad, LANES), jnp.float32),
        grid=(num_tiles,),
        in_specs=[
            # batch tile marches with the grid; last dim == full array dim,
            # so no feature-column padding is needed on the wrapper side.
            pl.BlockSpec((TB, in_features), lambda i: (i, 0)),
            # packed params: same block every step -> stays VMEM-resident.
            pl.BlockSpec((rows, hidden), lambda i: (0, 0)),
        ],
        out_specs=pl.BlockSpec((TB, LANES), lambda i: (i, 0)),
        compiler_params=pltpu.CompilerParams(
            dimension_semantics=("parallel",)),
    )(x_in, packed)

    # Strip batch padding and the lane padding of the action dimension.
    return out_pad[:B, :n_actions]


def init_params(key, in_features, hidden, n_actions):
    # Mimic PyTorch Linear default init: U(-1/sqrt(fan_in), 1/sqrt(fan_in)).
    k1, k2, k3, k4 = jax.random.split(key, 4)
    bound1 = 1.0 / jnp.sqrt(jnp.float32(in_features))
    bound2 = 1.0 / jnp.sqrt(jnp.float32(hidden))
    w1 = jax.random.uniform(k1, (in_features, hidden), jnp.float32, -bound1, bound1)
    b1 = jax.random.uniform(k2, (hidden,), jnp.float32, -bound1, bound1)
    w2 = jax.random.uniform(k3, (hidden, n_actions), jnp.float32, -bound2, bound2)
    b2 = jax.random.uniform(k4, (n_actions,), jnp.float32, -bound2, bound2)
    return w1, b1, w2, b2


def _ref_forward(x, w1, b1, w2, b2):
    return jnp.maximum(x @ w1 + b1[None, :], 0.0) @ w2 + b2[None, :]


if __name__ == "__main__":
    # CartPole-like sizes: obs dim 4, 2 actions, small batch.
    B, IN_FEATURES, N_ACTIONS = 8, 4, 2

    key = jax.random.PRNGKey(0)
    kx, kx2, kp = jax.random.split(key, 3)
    x = jax.random.normal(kx, (B, IN_FEATURES), jnp.float32)
    w1, b1, w2, b2 = init_params(kp, IN_FEATURES, HIDDEN, N_ACTIONS)

    # Pack once at init (amortized); the hot path does a single weight DMA.
    packed = pack_params(w1, b1, w2, b2)

    # --- single-tile online path (B=8) --------------------------------------
    out = rel_forward(x, packed, in_features=IN_FEATURES, n_actions=N_ACTIONS)
    out = jax.block_until_ready(out)
    ref = _ref_forward(x, w1, b1, w2, b2)
    assert out.shape == (B, N_ACTIONS)
    assert jnp.allclose(out, ref, atol=1e-4, rtol=1e-4)

    # --- multi-tile / ragged-batch path (exercises the >=2-step grid) -------
    B2 = 40
    x2 = jax.random.normal(kx2, (B2, IN_FEATURES), jnp.float32)
    out2 = jax.block_until_ready(
        rel_forward(x2, packed, in_features=IN_FEATURES, n_actions=N_ACTIONS))
    ref2 = _ref_forward(x2, w1, b1, w2, b2)
    assert out2.shape == (B2, N_ACTIONS)
    assert jnp.allclose(out2, ref2, atol=1e-4, rtol=1e-4)

    print("KERNEL_OK")
</pallas_src>

<mosaic_0001>
module attributes {stable_mosaic.version = 11 : i64} {
  func.func @rel_kernel(%arg0: i32, %arg1: memref<8x4xf32, #tpu.memory_space<vmem>>, %arg2: memref<152x128xf32, #tpu.memory_space<vmem>>, %arg3: memref<8x128xf32, #tpu.memory_space<vmem>>) attributes {dimension_semantics = [#tpu.dimension_semantics<parallel>], iteration_bounds = array<i64: 1>, scalar_prefetch = 0 : i64, scratch_operands = 0 : i64, tpu.core_type = #tpu.core_type<tc>, window_params = [{transform_indices = @transform_0, window_bounds = array<i64: 8, 4>}, {pipeline_mode = #tpu.pipeline_mode<synchronous>, transform_indices = @transform_1, window_bounds = array<i64: 152, 128>}, {transform_indices = @transform_2, window_bounds = array<i64: 8, 128>}]} {
    %c0 = arith.constant 0 : index
    %c0_0 = arith.constant 0 : index
    %0 = vector.load %arg1[%c0, %c0_0] : memref<8x4xf32, #tpu.memory_space<vmem>>, vector<8x4xf32>
    %c0_1 = arith.constant 0 : index
    %c0_2 = arith.constant 0 : index
    %1 = vector.load %arg2[%c0_1, %c0_2] : memref<152x128xf32, #tpu.memory_space<vmem>>, vector<4x128xf32>
    %c8 = arith.constant 8 : index
    %c0_3 = arith.constant 0 : index
    %2 = vector.load %arg2[%c8, %c0_3] : memref<152x128xf32, #tpu.memory_space<vmem>>, vector<1x128xf32>
    %c16 = arith.constant 16 : index
    %c0_4 = arith.constant 0 : index
    %3 = vector.load %arg2[%c16, %c0_4] : memref<152x128xf32, #tpu.memory_space<vmem>>, vector<128x128xf32>
    %c144 = arith.constant 144 : index
    %c0_5 = arith.constant 0 : index
    %4 = vector.load %arg2[%c144, %c0_5] : memref<152x128xf32, #tpu.memory_space<vmem>>, vector<1x128xf32>
    %cst = arith.constant dense<0.000000e+00> : vector<8x128xf32>
    %5 = tpu.matmul %0, %1, %cst {dimension_numbers = #tpu.dot_dimension_numbers<[1], [0], [0], [1], [0, 0, 1, 1], [], []>} : vector<8x4xf32>, vector<4x128xf32>, vector<8x128xf32> -> vector<8x128xf32>
    %6 = vector.broadcast %2 : vector<1x128xf32> to vector<8x128xf32>
    %7 = arith.addf %5, %6 : vector<8x128xf32>
    %cst_6 = arith.constant 0.000000e+00 : f32
    %8 = vector.broadcast %cst_6 : f32 to vector<8x128xf32>
    %9 = arith.maximumf %7, %8 : vector<8x128xf32>
    %cst_7 = arith.constant dense<0.000000e+00> : vector<8x128xf32>
    %10 = tpu.matmul %9, %3, %cst_7 {dimension_numbers = #tpu.dot_dimension_numbers<[1], [0], [0], [1], [0, 0, 1, 1], [], []>} : vector<8x128xf32>, vector<128x128xf32>, vector<8x128xf32> -> vector<8x128xf32>
    %11 = vector.broadcast %4 : vector<1x128xf32> to vector<8x128xf32>
    %12 = arith.addf %10, %11 : vector<8x128xf32>
    %c0_8 = arith.constant 0 : index
    %c0_9 = arith.constant 0 : index
    %13 = vector.load %arg3[%c0_8, %c0_9] : memref<8x128xf32, #tpu.memory_space<vmem>>, vector<8x128xf32>
    tpu.vector_store %arg3[%c0_8, %c0_9], %12 {strides = array<i32>} : memref<8x128xf32, #tpu.memory_space<vmem>>, vector<8x128xf32>,
    return
  }
  func.func @transform_0(%arg0: i32) -> (i32, i32) {
    %c0_i32 = arith.constant 0 : i32
    %c0_i32_0 = arith.constant 0 : i32
    return %arg0, %c0_i32 : i32, i32
  }
  func.func @transform_1(%arg0: i32) -> (i32, i32) {
    %c0_i32 = arith.constant 0 : i32
    %c0_i32_0 = arith.constant 0 : i32
    %c0_i32_1 = arith.constant 0 : i32
    return %c0_i32, %c0_i32_0 : i32, i32
  }
  func.func @transform_2(%arg0: i32) -> (i32, i32) {
    %c0_i32 = arith.constant 0 : i32
    %c0_i32_0 = arith.constant 0 : i32
    return %arg0, %c0_i32 : i32, i32
  }
}

</mosaic_0001>

<bundles_post_ra>
// kernel: rel_forward.1
= control target key start
LH: loop header
LB: loop body
LE: loop exit
PB: predicated region body
PF: predicated region fallthrough
CT: control target
= control target key end

     0   :  { %7 = vsyncpa [#allocation3], 0  ;;  %s137_s12 = smov [#allocation2]   ;;  %s138_s14 = smov 128   ;;  %s164_s0 = inlined_call_operand.vmem [shape: f32[8,4], index: 0, kind: input, shape index: {}]   ;;  %s165_s1 = inlined_call_operand.hbm [shape: f32[152,128], index: 1, kind: input, shape index: {}]   ;;  %s166_s2 = inlined_call_operand.vmem [shape: f32[8,128], index: 2, kind: output, shape index: {}]  }
   0x1   :  { %s14_s11 = sshll.u32 %s165_s1, 4  ;;  %s16_s13 = sshll.u32 %s137_s12, 4  ;;  %s15_s11 = int_to_ptr.hbm [resolvable:$true] %s14_s11  ;;  %s17_s13 = int_to_ptr.vmem [resolvable:$true] %s16_s13 }
   0x2   :  { %s139_s15 = smov 8  }
   0x3   :  { %22 = dma.hbm_to_vmem [thread:$0]  %s15_s11, 2432, %s17_s13, [#allocation3], %s138_s14, %s138_s14, %s139_s15  }
   0x4   :  { %135 = dma.done.wait [#allocation3], 2432  }
   0x5   :  { %136 = vsyncadd [#allocation3], 4294964864  ;;  %vm52_vm0 = vcmask 1043456   ;;  %vm48_vm1 = vcmask 31744   ;;  %v28_v0 = vld [vmem:[#allocation2] sm:$0xf] }
   0x6   :  { %v27_v1 = vld [vmem:[%s164_s0] sm:$0xff]  ;;  %v45_v2 = vld [vmem:[#allocation2 + $0x88] sm:$0xff]  ;;  %104 = vmatpush.msk.msra.mxu0 %vm52_vm0, %v28_v0  ;;  %v43_v4 = vld [vmem:[#allocation2 + $0x78] sm:$0xff] }
   0x7   :  { %78 = vmatpush.msra.mxu1 %v45_v2  ;;  %v44_v3 = vld [vmem:[#allocation2 + $0x80] sm:$0xff]  ;;  %105 = vmatmul.msk.f32.vlgmr.msra.gmra.mxu0 %vm48_vm1, %v27_v1  ;;  %v42_v5 = vld [vmem:[#allocation2 + $0x70] sm:$0xff]  ;;  %v41_v6 = vld [vmem:[#allocation2 + $0x68] sm:$0xff] }
   0x8   :  { %v40_v7 = vld [vmem:[#allocation2 + $0x60] sm:$0xff]  ;;  %v39_v8 = vld [vmem:[#allocation2 + $0x58] sm:$0xff]  ;;  %v38_v9 = vld [vmem:[#allocation2 + $0x50] sm:$0xff] }
   0x9   :  { %79 = vmatpush.msra.mxu1 %v44_v3  ;;  %v37_v10 = vld [vmem:[#allocation2 + $0x48] sm:$0xff]  ;;  %v36_v11 = vld [vmem:[#allocation2 + $0x40] sm:$0xff]  ;;  %v35_v12 = vld [vmem:[#allocation2 + $0x38] sm:$0xff] }
   0xa   :  { %v34_v13 = vld [vmem:[#allocation2 + $0x30] sm:$0xff]  ;;  %v33_v14 = vld [vmem:[#allocation2 + $0x28] sm:$0xff]  ;;  %v32_v15 = vld [vmem:[#allocation2 + $0x20] sm:$0xff] }
   0xb   :  { %80 = vmatpush.msra.mxu1 %v43_v4  ;;  %v31_v16 = vld [vmem:[#allocation2 + $0x18] sm:$0xff]  ;;  %v30_v17 = vld [vmem:[#allocation2 + $0x10] sm:$0xff]  ;;  %v109_v18 = vld [vmem:[#allocation2 + $0x8] ss:$0 sm:$0xff] }
   0xc   :  { %v110_v22 = vld [vmem:[#allocation2 + $0x90] ss:$0 sm:$0xff] }
   0xd   :  { %81 = vmatpush.msra.mxu1 %v42_v5 }
   0xf   :  { %82 = vmatpush.msra.mxu1 %v41_v6 }
  0x11   :  { %83 = vmatpush.msra.mxu1 %v40_v7 }
  0x13   :  { %84 = vmatpush.msra.mxu1 %v39_v8 }
  0x15   :  { %85 = vmatpush.msra.mxu1 %v38_v9 }
  0x17   :  { %86 = vmatpush.msra.mxu1 %v37_v10 }
  0x19   :  { %87 = vmatpush.msra.mxu1 %v36_v11 }
  0x1b   :  { %88 = vmatpush.msra.mxu1 %v35_v12 }
  0x1d   :  { %89 = vmatpush.msra.mxu1 %v34_v13 }
  0x1f   :  { %90 = vmatpush.msra.mxu1 %v33_v14 }
  0x21   :  { %91 = vmatpush.msra.mxu1 %v32_v15 }
  0x23   :  { %92 = vmatpush.msra.mxu1 %v31_v16 }
  0x25   :  { %93 = vmatpush.msra.mxu1 %v30_v17 }
  0x84   :  { %v73_v19 = vpop.f32.mrf.mxu0 }
  0x85   :  { %v74_v20 = vadd.f32 %v109_v18, %v73_v19 }
  0x87   :  { %v76_v21 = vmax.f32 %v74_v20, 0.0 }
  0x89   :  { %94 = vmatmul.f32.vlgmr.msra.gmra.mxu1 %v76_v21 }
 0x106   :  { %v95_v23 = vpop.f32.mrf.mxu1 }
 0x107   :  { %v96_v24 = vadd.f32 %v110_v22, %v95_v23 }
 0x109   :  { %98 = vst [vmem:[%s166_s2] sm:$0xff] %v96_v24 }
 0x10a   :  { %103 = vsyncpa [#allocation3], 1 }

</bundles_post_ra>
